<compile_context>
chip_gen: v5e
topology: v5e:2x2
jax: 0.10.0
libtpu: 0.0.40
codegen_flags: <defaults>
</compile_context>

<pallas_src>
import jax
import jax.numpy as jnp
import numpy as np
from jax.experimental import pallas as pl
from jax.experimental.pallas import tpu as pltpu


def get_embedding_size(n: int, max_size: int = 100) -> int:
    if n > 2:
        return min(round(1.6 * n ** 0.56), max_size)
    return 1


def _round_up(x: int, m: int) -> int:
    return ((x + m - 1) // m) * m


# ----------------------------- Pallas kernel ------------------------------ #

def _fused_embed_kernel(ids_ref, off_ref, table_ref, out_ref):
    # ids_ref:   (TILE_N, C)    int32 -- used categorical columns, this row tile
    # off_ref:   (1, C)         int32 -- per-column row offset into fused table
    # table_ref: (V_pad, E_pad) f32   -- block-diagonal combined embedding table
    # out_ref:   (TILE_N, E_pad) f32  -- concatenated embeddings (lane-dense)
    tn, num_cols = ids_ref.shape
    v_pad = table_ref.shape[0]
    ids = ids_ref[...] + off_ref[...]                       # (TILE_N, C)
    iota = jax.lax.broadcasted_iota(jnp.int32, (tn, v_pad), 1)
    counts = jnp.zeros((tn, v_pad), jnp.float32)
    for c in range(num_cols):                               # static, tiny C
        counts = counts + (iota == ids[:, c:c + 1]).astype(jnp.float32)
    # One MXU matmul covers every category (and sums grouped-category rows).
    out_ref[...] = jnp.dot(counts, table_ref[...],
                           preferred_element_type=jnp.float32)


def fused_embedding_lookup(ids: jax.Array, offsets: jax.Array,
                           table: jax.Array, tile_n: int) -> jax.Array:
    """ids: (N_pad, C) int32, offsets: (1, C) int32, table: (V_pad, E_pad) f32
    -> (N_pad, E_pad) f32 concatenated embeddings."""
    n_pad, num_cols = ids.shape
    v_pad, e_pad = table.shape
    grid = (n_pad // tile_n,)
    # VMEM budget: double-buffered ids/out tiles + resident table + one-hot
    # temporaries, with headroom; capped at 32 MiB (safe on v5e/v6e/v7x).
    need = (2 * tile_n * num_cols * 4 + 2 * tile_n * e_pad * 4
            + 2 * v_pad * e_pad * 4 + 2 * tile_n * v_pad * 4)
    vmem_limit = int(min(32 * 1024 * 1024, max(4 * need, 8 * 1024 * 1024)))
    return pl.pallas_call(
        _fused_embed_kernel,
        out_shape=jax.ShapeDtypeStruct((n_pad, e_pad), jnp.float32),
        grid_spec=pltpu.PrefetchScalarGridSpec(
            num_scalar_prefetch=0,
            grid=grid,
            in_specs=[
                pl.BlockSpec((tile_n, num_cols), lambda i: (i, 0)),
                pl.BlockSpec((1, num_cols), lambda i: (0, 0)),
                pl.BlockSpec((v_pad, e_pad), lambda i: (0, 0)),  # VMEM-resident
            ],
            out_specs=pl.BlockSpec((tile_n, e_pad), lambda i: (i, 0)),
        ),
        compiler_params=pltpu.CompilerParams(
            dimension_semantics=("parallel",),
            vmem_limit_bytes=vmem_limit,
        ),
    )(ids, offsets, table)


# --------------------------- MultiEmbedding (JAX) -------------------------- #

class MultiEmbedding:
    def __init__(self, embedding_sizes, x_categoricals=None,
                 categorical_groups=None, embedding_paddings=None,
                 max_embedding_size=None, key=None, tile_n=512):
        categorical_groups = categorical_groups or {}
        embedding_paddings = embedding_paddings or []
        if isinstance(embedding_sizes, dict):
            self.concat_output = False
            assert x_categoricals is not None, "x_categoricals must be provided."
        else:
            assert x_categoricals is None and len(categorical_groups) == 0
            embedding_sizes = {str(n): s for n, s in enumerate(embedding_sizes)}
            x_categoricals = list(embedding_sizes.keys())
            self.concat_output = True

        self.embedding_sizes = {
            name: (size, get_embedding_size(size)) if isinstance(size, int)
            else tuple(size)
            for name, size in embedding_sizes.items()
        }
        self.categorical_groups = categorical_groups
        self.embedding_paddings = embedding_paddings
        self.max_embedding_size = max_embedding_size
        self.x_categoricals = x_categoricals
        self.tile_n = tile_n

        # per-name parameter init (N(0,1), like nn.Embedding / nn.EmbeddingBag)
        key = key if key is not None else jax.random.PRNGKey(0)
        names = list(self.embedding_sizes.keys())
        keys = jax.random.split(key, len(names))
        self.tables = {}
        sizes = {}
        for k, name in zip(keys, names):
            vocab, emb = self.embedding_sizes[name]
            if self.max_embedding_size is not None:
                emb = min(emb, self.max_embedding_size)
            sizes[name] = (vocab, emb)
            table = jax.random.normal(k, (vocab, emb), dtype=jnp.float32)
            if name in self.embedding_paddings and name not in self.categorical_groups:
                table = table.at[0].set(0.0)  # padding_idx = 0 -> zero row
            self.tables[name] = table
        self.embedding_sizes = sizes

        # fused block-diagonal table (V padded to x8, E padded to x128) plus
        # per-used-column row offsets -> one Pallas call for all categories.
        row_off, col_off = {}, {}
        r = c = 0
        for name in names:
            vocab, emb = self.embedding_sizes[name]
            row_off[name], col_off[name] = r, c
            r, c = r + vocab, c + emb
        self.v_total, self.e_total = r, c
        self.v_pad = _round_up(max(r, 8), 8)
        self.e_pad = _round_up(max(c, 1), 128)
        combined = np.zeros((self.v_pad, self.e_pad), np.float32)
        for name in names:
            vocab, emb = self.embedding_sizes[name]
            combined[row_off[name]:row_off[name] + vocab,
                     col_off[name]:col_off[name] + emb] = np.asarray(self.tables[name])
        self.combined_table = jnp.asarray(combined)
        self.col_off = col_off

        id_cols, id_offs = [], []
        for name in names:
            if name in self.categorical_groups:
                group_cols = [self.x_categoricals.index(cat)
                              for cat in self.categorical_groups[name]]
            else:
                group_cols = [self.x_categoricals.index(name)]
            for col in group_cols:
                id_cols.append(col)
                id_offs.append(row_off[name])
        self.id_cols = jnp.asarray(id_cols, dtype=jnp.int32)
        self.row_offsets = jnp.asarray(id_offs, dtype=jnp.int32).reshape(1, -1)

    @property
    def input_size(self):
        return len(self.x_categoricals)

    @property
    def output_size(self):
        if self.concat_output:
            return sum(s[1] for s in self.embedding_sizes.values())
        return {name: s[1] for name, s in self.embedding_sizes.items()}

    def __call__(self, x: jax.Array):
        # x: (..., num_categoricals) ints, e.g. batch x time x categoricals
        lead = x.shape[:-1]
        n = int(np.prod(lead)) if lead else 1
        # single host-side gather of only the columns the embeddings use
        ids = jnp.take(x, self.id_cols, axis=-1).reshape(
            n, int(self.id_cols.shape[0])).astype(jnp.int32)
        tile_n = min(self.tile_n, _round_up(n, 8))
        n_pad = _round_up(n, tile_n)
        if n_pad != n:
            ids = jnp.pad(ids, ((0, n_pad - n), (0, 0)))
        out_pad = fused_embedding_lookup(ids, self.row_offsets,
                                         self.combined_table, tile_n)
        out_flat = out_pad[:n]
        if self.concat_output:
            return out_flat[:, :self.e_total].reshape(*lead, self.e_total)
        out = {}
        for name, (_, emb) in self.embedding_sizes.items():
            c0 = self.col_off[name]
            out[name] = out_flat[:, c0:c0 + emb].reshape(*lead, emb)
        return out


# ------------------------------ reference ---------------------------------- #

def reference_forward(module: MultiEmbedding, x: jax.Array):
    out = {}
    for name in module.embedding_sizes:
        table = module.tables[name]
        if name in module.categorical_groups:
            cols = [module.x_categoricals.index(c)
                    for c in module.categorical_groups[name]]
            ids = x[..., jnp.array(cols)]
            out[name] = jnp.take(table, ids, axis=0).sum(axis=-2)
        else:
            col = module.x_categoricals.index(name)
            out[name] = jnp.take(table, x[..., col], axis=0)
    if module.concat_output:
        return jnp.concatenate(list(out.values()), axis=-1)
    return out


# --------------------------------- main ------------------------------------ #

if __name__ == "__main__":
    key = jax.random.PRNGKey(0)
    k_p1, k_p2, k_a, k_b, k_c, k_d, k_e, k_f = jax.random.split(key, 8)

    # ---- dict mode: separate embeddings + EmbeddingBag group + padding_idx ----
    embedding_sizes = {"cat_a": 10, "cat_b": (20, 5), "grp": 7}
    categorical_groups = {"grp": ["cat_c", "cat_d"]}
    x_categoricals = ["cat_a", "cat_b", "cat_c", "cat_d"]
    embedding_paddings = ["cat_b"]

    module = MultiEmbedding(
        embedding_sizes, x_categoricals=x_categoricals,
        categorical_groups=categorical_groups,
        embedding_paddings=embedding_paddings,
        max_embedding_size=None, key=k_p1)

    B, T = 2, 8  # batch x time x categoricals
    x = jnp.stack([
        jax.random.randint(k_a, (B, T), 0, 10),
        jax.random.randint(k_b, (B, T), 0, 20),
        jax.random.randint(k_c, (B, T), 0, 7),
        jax.random.randint(k_d, (B, T), 0, 7),
    ], axis=-1).astype(jnp.int32)                      # (2, 8, 4)

    out = module(x)
    out = jax.tree_util.tree_map(jax.block_until_ready, out)
    ref = reference_forward(module, x)
    for name in out:
        assert out[name].shape == (B, T, module.embedding_sizes[name][1]), name
        np.testing.assert_allclose(np.asarray(out[name]), np.asarray(ref[name]),
                                   rtol=1e-5, atol=1e-5)

    # ---- list mode: concatenated output ----
    module2 = MultiEmbedding([4, (12, 3)], key=k_p2)
    x2 = jnp.stack([
        jax.random.randint(k_e, (B, T), 0, 4),
        jax.random.randint(k_f, (B, T), 0, 12),
    ], axis=-1).astype(jnp.int32)                      # (2, 8, 2)
    out2 = jax.block_until_ready(module2(x2))
    ref2 = reference_forward(module2, x2)
    assert out2.shape == (B, T, module2.output_size)
    np.testing.assert_allclose(np.asarray(out2), np.asarray(ref2),
                               rtol=1e-5, atol=1e-5)

    print("KERNEL_OK")
</pallas_src>

<mosaic_0001>
module attributes {stable_mosaic.version = 11 : i64} {
  func.func @_fused_embed_kernel(%arg0: i32, %arg1: memref<16x4xi32, #tpu.memory_space<vmem>>, %arg2: memref<1x4xi32, #tpu.memory_space<vmem>>, %arg3: memref<40x128xf32, #tpu.memory_space<vmem>>, %arg4: memref<16x128xf32, #tpu.memory_space<vmem>>) attributes {dimension_semantics = [#tpu.dimension_semantics<parallel>], iteration_bounds = array<i64: 1>, scalar_prefetch = 0 : i64, scratch_operands = 0 : i64, tpu.core_type = #tpu.core_type<tc>, window_params = [{transform_indices = @transform_0, window_bounds = array<i64: 16, 4>}, {pipeline_mode = #tpu.pipeline_mode<synchronous>, transform_indices = @transform_1, window_bounds = array<i64: 1, 4>}, {pipeline_mode = #tpu.pipeline_mode<synchronous>, transform_indices = @transform_2, window_bounds = array<i64: 40, 128>}, {transform_indices = @transform_3, window_bounds = array<i64: 16, 128>}]} {
    %c0 = arith.constant 0 : index
    %c0_0 = arith.constant 0 : index
    %0 = vector.load %arg1[%c0, %c0_0] : memref<16x4xi32, #tpu.memory_space<vmem>>, vector<16x4xi32>
    %c0_1 = arith.constant 0 : index
    %c0_2 = arith.constant 0 : index
    %1 = vector.load %arg2[%c0_1, %c0_2] : memref<1x4xi32, #tpu.memory_space<vmem>>, vector<1x4xi32>
    %2 = vector.broadcast %1 : vector<1x4xi32> to vector<16x4xi32>
    %3 = arith.addi %0, %2 : vector<16x4xi32>
    %4 = tpu.iota {dimensions = array<i32: 1>} : vector<16x40xi32>
    %cst = arith.constant 0.000000e+00 : f32
    %5 = vector.broadcast %cst : f32 to vector<16x40xf32>
    %6 = vector.extract_strided_slice %3 {offsets = [0, 0], sizes = [16, 1], strides = [1, 1]} : vector<16x4xi32> to vector<16x1xi32>
    %7 = vector.broadcast %6 : vector<16x1xi32> to vector<16x40xi32>
    %8 = arith.cmpi eq, %4, %7 : vector<16x40xi32>
    %9 = arith.extui %8 : vector<16x40xi1> to vector<16x40xi32>
    %10 = arith.sitofp %9 : vector<16x40xi32> to vector<16x40xf32>
    %11 = arith.addf %5, %10 : vector<16x40xf32>
    %12 = vector.extract_strided_slice %3 {offsets = [0, 1], sizes = [16, 1], strides = [1, 1]} : vector<16x4xi32> to vector<16x1xi32>
    %13 = vector.broadcast %12 : vector<16x1xi32> to vector<16x40xi32>
    %14 = arith.cmpi eq, %4, %13 : vector<16x40xi32>
    %15 = arith.extui %14 : vector<16x40xi1> to vector<16x40xi32>
    %16 = arith.sitofp %15 : vector<16x40xi32> to vector<16x40xf32>
    %17 = arith.addf %11, %16 : vector<16x40xf32>
    %18 = vector.extract_strided_slice %3 {offsets = [0, 2], sizes = [16, 1], strides = [1, 1]} : vector<16x4xi32> to vector<16x1xi32>
    %19 = vector.broadcast %18 : vector<16x1xi32> to vector<16x40xi32>
    %20 = arith.cmpi eq, %4, %19 : vector<16x40xi32>
    %21 = arith.extui %20 : vector<16x40xi1> to vector<16x40xi32>
    %22 = arith.sitofp %21 : vector<16x40xi32> to vector<16x40xf32>
    %23 = arith.addf %17, %22 : vector<16x40xf32>
    %24 = vector.extract_strided_slice %3 {offsets = [0, 3], sizes = [16, 1], strides = [1, 1]} : vector<16x4xi32> to vector<16x1xi32>
    %25 = vector.broadcast %24 : vector<16x1xi32> to vector<16x40xi32>
    %26 = arith.cmpi eq, %4, %25 : vector<16x40xi32>
    %27 = arith.extui %26 : vector<16x40xi1> to vector<16x40xi32>
    %28 = arith.sitofp %27 : vector<16x40xi32> to vector<16x40xf32>
    %29 = arith.addf %23, %28 : vector<16x40xf32>
    %c0_3 = arith.constant 0 : index
    %c0_4 = arith.constant 0 : index
    %30 = vector.load %arg3[%c0_3, %c0_4] : memref<40x128xf32, #tpu.memory_space<vmem>>, vector<40x128xf32>
    %cst_5 = arith.constant dense<0.000000e+00> : vector<16x128xf32>
    %31 = tpu.matmul %29, %30, %cst_5 {dimension_numbers = #tpu.dot_dimension_numbers<[1], [0], [0], [1], [0, 0, 1, 1], [], []>} : vector<16x40xf32>, vector<40x128xf32>, vector<16x128xf32> -> vector<16x128xf32>
    %c0_6 = arith.constant 0 : index
    %c0_7 = arith.constant 0 : index
    %32 = vector.load %arg4[%c0_6, %c0_7] : memref<16x128xf32, #tpu.memory_space<vmem>>, vector<16x128xf32>
    tpu.vector_store %arg4[%c0_6, %c0_7], %31 {strides = array<i32>} : memref<16x128xf32, #tpu.memory_space<vmem>>, vector<16x128xf32>,
    return
  }
  func.func @transform_0(%arg0: i32) -> (i32, i32) {
    %c0_i32 = arith.constant 0 : i32
    %c0_i32_0 = arith.constant 0 : i32
    return %arg0, %c0_i32 : i32, i32
  }
  func.func @transform_1(%arg0: i32) -> (i32, i32) {
    %c0_i32 = arith.constant 0 : i32
    %c0_i32_0 = arith.constant 0 : i32
    %c0_i32_1 = arith.constant 0 : i32
    return %c0_i32, %c0_i32_0 : i32, i32
  }
  func.func @transform_2(%arg0: i32) -> (i32, i32) {
    %c0_i32 = arith.constant 0 : i32
    %c0_i32_0 = arith.constant 0 : i32
    %c0_i32_1 = arith.constant 0 : i32
    return %c0_i32, %c0_i32_0 : i32, i32
  }
  func.func @transform_3(%arg0: i32) -> (i32, i32) {
    %c0_i32 = arith.constant 0 : i32
    %c0_i32_0 = arith.constant 0 : i32
    return %arg0, %c0_i32 : i32, i32
  }
}

</mosaic_0001>

<bundles_post_ra>
// kernel: tpu_custom_call.1
= control target key start
LH: loop header
LB: loop body
LE: loop exit
PB: predicated region body
PF: predicated region fallthrough
CT: control target
= control target key end

     0   :  { %8 = vsyncpa [#allocation3], 0  ;;  %s283_s0 = inlined_call_operand.vmem [shape: s32[16,4], index: 0, kind: input, shape index: {}]   ;;  %s284_s1 = inlined_call_operand.vmem [shape: s32[1,4], index: 1, kind: input, shape index: {}]   ;;  %s285_s2 = inlined_call_operand.hbm [shape: f32[40,128], index: 2, kind: input, shape index: {}]   ;;  %s286_s3 = inlined_call_operand.hbm [shape: f32[16,128], index: 3, kind: output, shape index: {}]  }
   0x1   :  { %9 = vsyncpa [#allocation4], 0  ;;  %s18_s14 = sshll.u32 %s285_s2, 4  ;;  %s233_s15 = smov [#allocation2]   ;;  %s19_s14 = int_to_ptr.hbm [resolvable:$true] %s18_s14 }
   0x2   :  { %s20_s16 = sshll.u32 %s233_s15, 4  ;;  %s234_s17 = smov 128   ;;  %s21_s16 = int_to_ptr.vmem [resolvable:$true] %s20_s16 }
   0x3   :  { %s235_s18 = smov 8  }
   0x4   :  { %26 = dma.hbm_to_vmem [thread:$0]  %s19_s14, 640, %s21_s16, [#allocation3], %s234_s17, %s234_s17, %s235_s18  }
   0x5   :  { %229 = dma.done.wait [#allocation3], 640  }
   0x6   :  { %230 = vsyncadd [#allocation3], 4294966656  ;;  %v236_v0 = vmov 1   ;;  %v237_v1 = vmov 0   ;;  %v238_v2 = vmov 2   ;;  %v31_v3 = vld [vmem:[%s283_s0] sm:$0xff]  ;;  %v37_v14 = vlaneseq }
   0x7   :  { %176 = vset.pattern.permute.xlu1 %v236_v0  ;;  %175 = vset.pattern.permute.xlu0 %v237_v1  ;;  %v180_v4 = vld [vmem:[%s284_s1] ss:$0 sm:$0xff]  ;;  %v32_v6 = vld [vmem:[%s283_s0 + $0x8] sm:$0xff]  ;;  %v239_v8 = vmov 3   ;;  %v98_v10 = vld [vmem:[#allocation2 + $0x18] sm:$0xff]  ;;  %v240_v21 = vmov 0.0  }
   0x8   :  { %177 = vset.pattern.permute.xlu2 %v238_v2  ;;  %v35_v5 = vadd.s32 %v180_v4, %v31_v3  ;;  %v36_v7 = vadd.s32 %v180_v4, %v32_v6  ;;  %v99_v9 = vld [vmem:[#allocation2 + $0x20] sm:$0xff]  ;;  %v97_v11 = vld [vmem:[#allocation2 + $0x10] sm:$0xff]  ;;  %v96_v12 = vld [vmem:[#allocation2 + $0x8] sm:$0xff]  ;;  %v38_v18 = vand.u32 127, %v37_v14  ;;  %vm100_vm8 = vcmask 326656   ;;  %s241_s0 = smov [#allocation5]  }
   0x9   :  { %118 = vmatpush.msra.mxu0 %v99_v9  ;;  %161 = vmatpush.msra.mxu1 %v99_v9  ;;  %v95_v13 = vld [vmem:[#allocation2] sm:$0xff]  ;;  %s136_s1 = sshll.u32 %s241_s0, 4  ;;  %s138_s26 = sshll.u32 %s286_s3, 4  ;;  %s137_s1 = int_to_ptr.vmem [resolvable:$true] %s136_s1  ;;  %s139_s26 = int_to_ptr.hbm [resolvable:$true] %s138_s26 }
   0xa   :  { %54 = vperm.xlu1 %176, %v35_v5   ;;  %40 = vperm.xlu0 %175, %v35_v5  }
   0xb   :  { %68 = vperm.xlu2 %177, %v35_v5   ;;  %119 = vmatpush.msra.mxu0 %v98_v10 }
   0xc   :  { %162 = vmatpush.msra.mxu1 %v98_v10 }
   0xd   :  { %120 = vmatpush.msra.mxu0 %v97_v11 }
   0xe   :  { %163 = vmatpush.msra.mxu1 %v97_v11 }
   0xf   :  { %121 = vmatpush.msra.mxu0 %v96_v12 }
  0x10   :  { %164 = vmatpush.msra.mxu1 %v96_v12 }
  0x11   :  { %122 = vmatpush.msra.mxu0 %v95_v13 }
  0x12   :  { %57 = vperm.xlu1 %176, %v36_v7   ;;  %43 = vperm.xlu0 %175, %v36_v7  }
  0x13   :  { %71 = vperm.xlu2 %177, %v36_v7   ;;  %165 = vmatpush.msra.mxu1 %v95_v13 }
  0x1a   :  { %179 = vset.pattern.permute.xlu1 %v239_v8  ;;  %178 = vset.pattern.permute.xlu0 %v239_v8 }
  0x1b   :  { %85 = vperm.xlu1 %179, %v36_v7   ;;  %82 = vperm.xlu0 %178, %v35_v5  }
  0x65   :  { %v69_v17 = vpop.permute.xlu2 %68 }
  0x66   :  { %vm73_vm4 = vcmp.eq.s32.totalorder %v38_v18, %v69_v17 }
  0x67   :  { %v155_v29 = vsel %vm73_vm4, 1.0, %v240_v21 }
  0x6d   :  { %v72_v24 = vpop.permute.xlu2 %71 }
  0x6e   :  { %vm74_vm5 = vcmp.eq.s32.totalorder %v38_v18, %v72_v24 }
  0x6f   :  { %v156_v30 = vsel %vm74_vm5, 1.0, %v240_v21 }
  0x7c   :  { %v55_v15 = vpop.permute.xlu1 %54  ;;  %v41_v16 = vpop.permute.xlu0 %40 }
  0x7d   :  { %vm59_vm0 = vcmp.eq.s32.totalorder %v38_v18, %v55_v15  ;;  %vm45_vm1 = vcmp.eq.s32.totalorder %v38_v18, %v41_v16 }
  0x7e   :  { %v153_v22 = vsel %vm59_vm0, 1.0, %v240_v21  ;;  %v151_v23 = vsel %vm45_vm1, 1.0, %v240_v21 }
  0x7f   :  { %v65_v27 = vadd.f32 %v153_v22, %v151_v23 }
  0x81   :  { %v79_v34 = vadd.f32 %v155_v29, %v65_v27 }
  0x84   :  { %v58_v19 = vpop.permute.xlu1 %57  ;;  %v44_v20 = vpop.permute.xlu0 %43 }
  0x85   :  { %vm60_vm2 = vcmp.eq.s32.totalorder %v38_v18, %v58_v19  ;;  %vm46_vm3 = vcmp.eq.s32.totalorder %v38_v18, %v44_v20 }
  0x86   :  { %v154_v25 = vsel %vm60_vm2, 1.0, %v240_v21  ;;  %v152_v26 = vsel %vm46_vm3, 1.0, %v240_v21 }
  0x87   :  { %v66_v28 = vadd.f32 %v154_v25, %v152_v26 }
  0x89   :  { %v80_v33 = vadd.f32 %v156_v30, %v66_v28 }
  0x8d   :  { %v86_v31 = vpop.permute.xlu1 %85  ;;  %v83_v32 = vpop.permute.xlu0 %82 }
  0x8e   :  { %vm88_vm6 = vcmp.eq.s32.totalorder %v38_v18, %v86_v31  ;;  %vm87_vm7 = vcmp.eq.s32.totalorder %v38_v18, %v83_v32 }
  0x8f   :  { %v158_v35 = vsel %vm88_vm6, 1.0, %v240_v21  ;;  %v157_v36 = vsel %vm87_vm7, 1.0, %v240_v21 }
  0x90   :  { %v94_v37 = vadd.f32 %v158_v35, %v80_v33  ;;  %v93_v38 = vadd.f32 %v157_v36, %v79_v34 }
  0x92   :  { %159 = vmatmul.msk.f32.vlgmr.msra.gmra.mxu0 %vm100_vm8, %v93_v38  ;;  %160 = vmatmul.msk.f32.vlgmr.msra.gmra.mxu1 %vm100_vm8, %v94_v37 }
 0x10f   :  { %v124_v39 = vpop.f32.mrf.mxu0  ;;  %v127_v40 = vpop.f32.mrf.mxu1 }
 0x110   :  { %130 = vst [vmem:[#allocation5] sm:$0xff] %v124_v39 }
 0x111   :  { %131 = vst [vmem:[#allocation5 + $0x8] sm:$0xff] %v127_v40 }
 0x112   :  { %144 = dma.vmem_to_hbm [thread:$0]  %s137_s1, 256, %s139_s26, [#allocation4], %s234_s17, %s234_s17, %s235_s18  }
 0x113   :  { %231 = dma.done.wait [#allocation4], 256  }
 0x114   :  { %232 = vsyncadd [#allocation4], 4294967040 }
 0x115   :  { %149 = vsyncpa [#allocation3], 1 }
 0x116   :  { %150 = vsyncpa [#allocation4], 1 }

</bundles_post_ra>
